<compile_context>
chip_gen: v7x
topology: tpu7x:2x2x1
jax: 0.10.0
libtpu: 0.0.40
codegen_flags: <defaults>
</compile_context>

<pallas_src>
import math

import jax
import jax.numpy as jnp
from jax import lax
from jax.experimental import pallas as pl
from jax.experimental.pallas import tpu as pltpu


# ----------------------------------------------------------------------------
# Pallas kernel: fused 1x1-conv heads as one matmul + bias, NHWC tile output.
# ----------------------------------------------------------------------------
def _fused_head_kernel(x_ref, w_ref, b_ref, y_ref):
    # x_ref : (1, C_in, TM)   activation tile (compute dtype), spatial on lanes
    # w_ref : (C_in, C_pad)   fused + lane-padded 1x1-conv weight (grid-resident)
    # b_ref : (1, C_pad)      fused + lane-padded bias, f32 (grid-resident)
    # y_ref : (1, TM, C_pad)  NHWC-style tile: spatial on sublanes, channels on lanes
    x = x_ref[0]                                            # (C_in, TM)
    # Contract on C_in (TN dimension numbers) so the MXU result lands directly
    # as (TM, C_pad): no post-kernel transpose pass, dense 128-lane stores.
    y = lax.dot_general(x, w_ref[...], (((0,), (0,)), ((), ())),
                        preferred_element_type=jnp.float32)  # (TM, C_pad)
    y_ref[0] = (y + b_ref[...]).astype(y_ref.dtype)


def anchor_head_forward(x_nchw, params, *, tm=4096,
                        compute_dtype=jnp.bfloat16,
                        out_dtype=jnp.float32):
    """Fused AnchorHeadSingle forward (three 1x1-conv heads) on NCHW input.

    x_nchw: (N, C_in, H, W)
    params: dict with fused/lane-padded kernel weight & bias + per-head sizes.
    Returns (cls_preds, box_preds, dir_preds) in NHWC, matching the PyTorch
    module's conv + permute(0, 2, 3, 1) outputs.
    """
    N, C_in, H, W = x_nchw.shape
    HW = H * W

    w_fused = params["w_fused"]                  # (C_in, c_pad), zero-padded cols
    b_fused = params["b_fused"]                  # (1, c_pad)
    c_cls, c_box, c_dir = params["head_sizes"]
    c_total = c_cls + c_box + c_dir
    assert w_fused.shape[0] == C_in

    # Lane-pad the fused output-channel dim to a multiple of 128 (zero rows) if
    # the caller handed us an unpadded fused weight (build_* already pads).
    c_pad = w_fused.shape[1]
    if c_pad % 128 != 0:
        extra = pl.cdiv(c_pad, 128) * 128 - c_pad
        w_fused = jnp.pad(w_fused, ((0, 0), (0, extra)))
        b_fused = jnp.pad(b_fused, ((0, 0), (0, extra)))
        c_pad += extra
    assert c_pad >= c_total

    # Spatial tiling: input lanes / output sublanes.
    #  * HW <= tm: single full-extent block (no padding, no clipping).
    #  * HW  > tm: 128-aligned tile; Pallas clips the ragged last block.
    tm_eff = HW if HW <= tm else max(128, (tm // 128) * 128)
    # v7x megacore: keep >= 2 parallel grid steps when the problem allows it
    # (2 TensorCores share the "parallel" axes; harmless on v5e/v6e).
    if N * pl.cdiv(HW, tm_eff) < 2 and HW >= 256:
        tm_eff = pl.cdiv(pl.cdiv(HW, 2), 128) * 128
    n_sp = pl.cdiv(HW, tm_eff)
    grid = (N, n_sp)

    # bf16 at the boundary halves input/weight HBM bytes (kernel is HBM-bound);
    # no jnp.pad and no NCHW->NHWC transpose of the activations.
    x_flat = x_nchw.reshape(N, C_in, HW).astype(compute_dtype)
    w_k = w_fused.astype(compute_dtype)
    b_k = b_fused.astype(jnp.float32)

    # Per-chip VMEM budget: need-based (double-buffered tiles + resident
    # weight/bias), floored at the 16 MiB default scope and capped at 75% of
    # this chip's VMEM capacity (64 MiB/TC on v7x, 128 MiB on v5e/v6e).
    in_b = jnp.dtype(compute_dtype).itemsize
    out_b = jnp.dtype(out_dtype).itemsize
    need = (2 * C_in * tm_eff * in_b              # double-buffered activation tiles
            + 2 * tm_eff * c_pad * out_b          # double-buffered output tiles
            + C_in * c_pad * in_b + c_pad * 4)    # resident weight + bias
    try:
        vmem_cap = int(pltpu.get_tpu_info().vmem_capacity_bytes)
    except Exception:
        vmem_cap = 64 << 20                       # conservative (v7x per-TC VMEM)
    vmem_limit = int(min(max(2 * need + (4 << 20), 16 << 20), (vmem_cap * 3) // 4))

    y = pl.pallas_call(
        _fused_head_kernel,
        out_shape=jax.ShapeDtypeStruct((N, HW, c_pad), out_dtype),
        grid_spec=pltpu.PrefetchScalarGridSpec(
            num_scalar_prefetch=0,
            grid=grid,
            in_specs=[
                # TODO(synk): pipeline_mode=pl.Buffered(3) on this spec if v7x
                #             profiling shows exposed DMA at tile boundaries.
                pl.BlockSpec((1, C_in, tm_eff), lambda n, s: (n, 0, s)),
                pl.BlockSpec((C_in, c_pad), lambda n, s: (0, 0)),
                pl.BlockSpec((1, c_pad), lambda n, s: (0, 0)),
            ],
            out_specs=pl.BlockSpec((1, tm_eff, c_pad), lambda n, s: (n, s, 0)),
        ),
        compiler_params=pltpu.CompilerParams(
            dimension_semantics=("parallel", "parallel"),
            vmem_limit_bytes=vmem_limit,
        ),
    )(x_flat, w_k, b_k)

    # Boundary glue: free reshape to NHWC + cheap static channel slices per head
    # (no transpose pass -- the kernel already put channels on the lane axis).
    y_nhwc = y.reshape(N, H, W, c_pad)
    cls_preds = y_nhwc[..., :c_cls]
    box_preds = y_nhwc[..., c_cls:c_cls + c_box]
    dir_preds = y_nhwc[..., c_cls + c_box:c_total]
    return cls_preds, box_preds, dir_preds


# ----------------------------------------------------------------------------
# Module construction (deterministic, synthetic — no file / checkpoint loads)
# ----------------------------------------------------------------------------
def build_anchor_head_params(key, inplanes, num_classes, anchor_classes,
                             code_size, num_dir_bins, init_prior=0.01):
    # num_anchors_per_location, same logic as the PyTorch __init__.
    num_anchors_per_location = []
    for ac in anchor_classes:
        num_rotations = len(ac["anchor_rotations"])
        num_size = len(ac["anchor_sizes"])
        num_class = len(ac["anchor_bottom_heights"])
        num_anchors_per_location.append(num_rotations * num_size * num_class)
    num_anchors = sum(num_anchors_per_location)

    c_cls = num_anchors * num_classes
    c_box = num_anchors * code_size
    c_dir = num_anchors * num_dir_bins
    c_total = c_cls + c_box + c_dir
    c_pad = pl.cdiv(c_total, 128) * 128           # lane-pad fused output channels

    k1, k2, k3 = jax.random.split(key, 3)
    # 1x1 conv weights, PyTorch layout (out, in, 1, 1) squeezed to (out, in).
    w_cls = 0.01 * jax.random.normal(k1, (c_cls, inplanes), jnp.float32)
    w_box = 0.01 * jax.random.normal(k2, (c_box, inplanes), jnp.float32)
    w_dir = 0.01 * jax.random.normal(k3, (c_dir, inplanes), jnp.float32)

    # init_bias_focal (sigmoid): bias = -log((1 - prior) / prior) on cls head.
    b_cls = jnp.full((c_cls,), -math.log((1.0 - init_prior) / init_prior),
                     jnp.float32)
    b_box = jnp.zeros((c_box,), jnp.float32)
    b_dir = jnp.zeros((c_dir,), jnp.float32)

    # Fuse the three heads once at build time, in kernel layout (C_in, c_pad)
    # with zero-padded extra output channels: one MXU pass + dense lane stores.
    w_cat = jnp.concatenate([w_cls, w_box, w_dir], axis=0)       # (c_total, C_in)
    b_cat = jnp.concatenate([b_cls, b_box, b_dir])               # (c_total,)
    w_fused = jnp.zeros((inplanes, c_pad), jnp.float32).at[:, :c_total].set(w_cat.T)
    b_fused = jnp.zeros((1, c_pad), jnp.float32).at[:, :c_total].set(b_cat)

    params = dict(
        w_cls=w_cls, b_cls=b_cls, w_box=w_box, b_box=b_box,
        w_dir=w_dir, b_dir=b_dir,
        w_fused=w_fused, b_fused=b_fused,
        head_sizes=(c_cls, c_box, c_dir),
    )
    return params, num_anchors


def anchor_head_single_forward(inputs, params, num_anchors, **kw):
    """Mirror of AnchorHeadSingle.forward (tocaffe=False branch)."""
    features = inputs["spatial_features_2d"]      # (N, C, H, W)
    cls_preds, box_preds, dir_cls_preds = anchor_head_forward(features, params, **kw)
    return {
        "cls_preds": cls_preds,
        "box_preds": box_preds,
        "dir_pred": dir_cls_preds,
        "num_anchors": num_anchors,
    }


if __name__ == "__main__":
    key = jax.random.PRNGKey(0)
    kx1, kx2, kp = jax.random.split(key, 3)

    # Small synthetic config (in place of base_anchors_file JSON).
    anchor_classes = [
        {"anchor_rotations": [0.0, 1.57], "anchor_sizes": [[3.9, 1.6, 1.56]],
         "anchor_bottom_heights": [-1.78]},
        {"anchor_rotations": [0.0, 1.57], "anchor_sizes": [[0.8, 0.6, 1.73]],
         "anchor_bottom_heights": [-0.6]},
    ]
    inplanes = 8
    num_classes = 3
    code_size = 7
    num_dir_bins = 2

    params, num_anchors = build_anchor_head_params(
        kp, inplanes, num_classes, anchor_classes, code_size, num_dir_bins)
    c_cls, c_box, c_dir = params["head_sizes"]

    def run_and_check(x):
        N, _, H, W = x.shape
        out = anchor_head_single_forward({"spatial_features_2d": x}, params,
                                         num_anchors)
        jax.block_until_ready(out["cls_preds"])
        jax.block_until_ready(out["box_preds"])
        jax.block_until_ready(out["dir_pred"])

        # Plain-JAX f32 reference (1x1 conv == channel matmul), bf16 tolerance.
        ref_cls = jnp.einsum("nchw,oc->nhwo", x, params["w_cls"]) + params["b_cls"]
        ref_box = jnp.einsum("nchw,oc->nhwo", x, params["w_box"]) + params["b_box"]
        ref_dir = jnp.einsum("nchw,oc->nhwo", x, params["w_dir"]) + params["b_dir"]
        assert out["cls_preds"].shape == (N, H, W, c_cls)
        assert out["box_preds"].shape == (N, H, W, c_box)
        assert out["dir_pred"].shape == (N, H, W, c_dir)
        assert jnp.allclose(out["cls_preds"], ref_cls, atol=5e-3)
        assert jnp.allclose(out["box_preds"], ref_box, atol=5e-3)
        assert jnp.allclose(out["dir_pred"], ref_dir, atol=5e-3)

    # Test 1: batch=2, 16x16 BEV map (spatial exactly covered by one tile).
    x1 = jax.random.normal(kx1, (2, inplanes, 16, 16), jnp.float32)   # NCHW
    run_and_check(x1)

    # Test 2: batch=1, 16x20 BEV map — exercises the megacore tile split and the
    # ragged last spatial block (clipped reads/stores, no wrapper-side padding).
    x2 = jax.random.normal(kx2, (1, inplanes, 16, 20), jnp.float32)
    run_and_check(x2)

    print("KERNEL_OK")
</pallas_src>

<mosaic_0001>
module attributes {stable_mosaic.version = 11 : i64} {
  func.func @_fused_head_kernel(%arg0: i32, %arg1: i32, %arg2: memref<1x8x256xbf16, #tpu.memory_space<vmem>>, %arg3: memref<8x128xbf16, #tpu.memory_space<vmem>>, %arg4: memref<1x128xf32, #tpu.memory_space<vmem>>, %arg5: memref<1x256x128xf32, #tpu.memory_space<vmem>>) attributes {dimension_semantics = [#tpu.dimension_semantics<parallel>, #tpu.dimension_semantics<parallel>], iteration_bounds = array<i64: 2, 1>, scalar_prefetch = 0 : i64, scratch_operands = 0 : i64, tpu.core_type = #tpu.core_type<tc>, window_params = [{transform_indices = @transform_0, window_bounds = array<i64: 1, 8, 256>}, {pipeline_mode = #tpu.pipeline_mode<synchronous>, transform_indices = @transform_1, window_bounds = array<i64: 8, 128>}, {pipeline_mode = #tpu.pipeline_mode<synchronous>, transform_indices = @transform_2, window_bounds = array<i64: 1, 128>}, {transform_indices = @transform_3, window_bounds = array<i64: 1, 256, 128>}]} {
    %c0 = arith.constant 0 : index
    %c0_0 = arith.constant 0 : index
    %c0_1 = arith.constant 0 : index
    %0 = vector.load %arg2[%c0, %c0_0, %c0_1] : memref<1x8x256xbf16, #tpu.memory_space<vmem>>, vector<1x8x256xbf16>
    %1 = vector.shape_cast %0 : vector<1x8x256xbf16> to vector<8x256xbf16>
    %c0_2 = arith.constant 0 : index
    %c0_3 = arith.constant 0 : index
    %2 = vector.load %arg3[%c0_2, %c0_3] : memref<8x128xbf16, #tpu.memory_space<vmem>>, vector<8x128xbf16>
    %cst = arith.constant dense<0.000000e+00> : vector<256x128xf32>
    %3 = tpu.matmul %1, %2, %cst {dimension_numbers = #tpu.dot_dimension_numbers<[0], [0], [1], [1], [0, 1, 1, 1], [], []>} : vector<8x256xbf16>, vector<8x128xbf16>, vector<256x128xf32> -> vector<256x128xf32>
    %c0_4 = arith.constant 0 : index
    %c0_5 = arith.constant 0 : index
    %4 = vector.load %arg4[%c0_4, %c0_5] : memref<1x128xf32, #tpu.memory_space<vmem>>, vector<1x128xf32>
    %5 = vector.broadcast %4 : vector<1x128xf32> to vector<256x128xf32>
    %6 = arith.addf %3, %5 : vector<256x128xf32>
    %c0_6 = arith.constant 0 : index
    %c0_7 = arith.constant 0 : index
    %c0_8 = arith.constant 0 : index
    %7 = vector.load %arg5[%c0_6, %c0_7, %c0_8] : memref<1x256x128xf32, #tpu.memory_space<vmem>>, vector<1x256x128xf32>
    %8 = vector.shape_cast %7 : vector<1x256x128xf32> to vector<256x128xf32>
    %9 = vector.shape_cast %6 : vector<256x128xf32> to vector<1x256x128xf32>
    tpu.vector_store %arg5[%c0_6, %c0_7, %c0_8], %9 {strides = array<i32>} : memref<1x256x128xf32, #tpu.memory_space<vmem>>, vector<1x256x128xf32>,
    return
  }
  func.func @transform_0(%arg0: i32, %arg1: i32) -> (i32, i32, i32) {
    %c0_i32 = arith.constant 0 : i32
    %c0_i32_0 = arith.constant 0 : i32
    return %arg0, %c0_i32, %arg1 : i32, i32, i32
  }
  func.func @transform_1(%arg0: i32, %arg1: i32) -> (i32, i32) {
    %c0_i32 = arith.constant 0 : i32
    %c0_i32_0 = arith.constant 0 : i32
    %c0_i32_1 = arith.constant 0 : i32
    return %c0_i32, %c0_i32_0 : i32, i32
  }
  func.func @transform_2(%arg0: i32, %arg1: i32) -> (i32, i32) {
    %c0_i32 = arith.constant 0 : i32
    %c0_i32_0 = arith.constant 0 : i32
    %c0_i32_1 = arith.constant 0 : i32
    return %c0_i32, %c0_i32_0 : i32, i32
  }
  func.func @transform_3(%arg0: i32, %arg1: i32) -> (i32, i32, i32) {
    %c0_i32 = arith.constant 0 : i32
    %c0_i32_0 = arith.constant 0 : i32
    return %arg0, %arg1, %c0_i32 : i32, i32, i32
  }
}

</mosaic_0001>

<bundles_post_ra>
// kernel: tpu_custom_call.1
= control target key start
LH: loop header
LB: loop body
LE: loop exit
PB: predicated region body
PF: predicated region fallthrough
CT: control target
= control target key end

     0   :  { %8 = vsyncpa [#allocation3], 0  ;;  %s1277_s0 = inlined_call_operand.hbm [shape: bf16[2,8,256], index: 0, kind: input, shape index: {}]   ;;  %s1278_s1 = inlined_call_operand.hbm [shape: bf16[8,128], index: 1, kind: input, shape index: {}]   ;;  %s1279_s2 = inlined_call_operand.vmem [shape: f32[1,128], index: 2, kind: input, shape index: {}]   ;;  %s1280_s3 = inlined_call_operand.hbm [shape: f32[2,256,128], index: 3, kind: output, shape index: {}]  }
   0x1   :  { %10 = vsyncpa [#allocation3 + $0x1], 0 }
   0x2   :  { %11 = vsyncpa [#allocation6], 0 }
   0x3   :  { %12 = vsyncpa [#allocation4], 0 }
   0x4   :  { %14 = vsyncpa [#allocation4 + $0x1], 0  ;;  %s970_s12 = smov 0   ;;  %s972_s13 = smov 0  }
   0x5   :  { %s974_s14 = smov 0   ;;  %s976_s15 = smov 0  }
   0x6   :  { %s978_s16 = smov 0   ;;  %s980_s17 = smov 0  }
   0x7 LB: > { %s628_s18 = sadd.s32 4294967295, %s943_s17   ;;  %s629_s19 = sadd.s32 4294967294, %s943_s17   ;;  %s943_s17 = sphi %s980_s17, %s20_s17   ;;  %s939_s16 = sphi %s978_s16, %s1305_s16   ;;  %s935_s15 = sphi %s976_s15, %s1304_s15   ;;  %s931_s14 = sphi %s974_s14, %s1303_s14   ;;  %s927_s13 = sphi %s972_s13, %s1302_s13   ;;  %s923_s12 = sphi %s970_s12, %s1301_s12  }
   0x8   : > { %p54_p0 = scmp.ne.s32.totalorder %s927_s13, %s923_s12  ;;  %p1004_p1 = scmp.eq.s32.totalorder %s628_s18, 0 }
   0x9   : > { %p1008_p2 = scmp.eq.s32.totalorder %s628_s18, 1  ;;  %p128_p3 = scmp.eq.s32.totalorder %s629_s19, 1 }
   0xa   : > { %s1285_s20 = scalar_select %p1004_p1, 1, 0 }
   0xb   : > { %s1286_s21 = scalar_select %p1008_p2, 1, 0 }
   0xc   : > { %p1014_p4 = por %p1004_p1, %p54_p0  ;;  %p630_p5 = scmp.ge.s32.totalorder %s943_s17, 1 }
   0xd   : > { %p1019_p6 = por %p128_p3, %p54_p0  ;;  %p135_p7 = scmp.lt.s32.totalorder %s943_s17, 3 }
   0xe   : > { %s1287_s22 = scalar_select %p1014_p4, 1, 0 }
   0xf   : > { %s1288_s23 = scalar_select %p1019_p6, 1, 0 }
  0x10   : > { %p1024_p8 = pnand %p630_p5, %p135_p7  ;;  %s945_s25 = smov [#allocation5]  }
  0x11   : > { %s148_s26 = sshll.u32 %s945_s25, 4  ;;  %s32_s28 = sadd.s32 1, %s939_s16  ;;  %s149_s26 = int_to_ptr.vmem [resolvable:$true] %s148_s26 }
  0x12   : > { %s1289_s24 = scalar_select %p1024_p8, 1, 0 }
  0x13   : > { %p729_p10 = pneg %p1024_p8  ;;  %s41_s29 = sadd.s32 1, %s931_s14 }
  0x14   : > { %p1039_p12 = scmp.ge.s32.totalorder %s32_s28, 2  ;;  %s799_s6 = scalar_lea.hbm %s1278_s1, 64 }
  0x15   : > { %p1033_p11 = pnand %p729_p10, %p1004_p1  ;;  %p800_p13 = scmp.ne.s32.totalorder %s1278_s1, %s799_s6 }
  0x16   : > { %s1291_s30 = scalar_select %p1039_p12, 1, 0 }
  0x17   : > { %p801_p0 = pneg %p1033_p11  ;;  %p806_p7 = scmp.lt.u32.totalorder %s799_s6, %s1278_s1 }
  0x19   : > { %p802_p3 = pnand %p801_p0, %p800_p13 }
  0x1b   : > { %p803_p5 = pneg %p802_p3 }
  0x1d   : > { %p808_p10 = pnand %p806_p7, %p803_p5 }
  0x1f   : > { %811 = shalt.err (!%p808_p10)
}
  0x20   : > { %s812_s11 = scalar_lea.vmem %s149_s26, 64  ;;  %p820_p4 = scmp.lt.s32.totalorder %s149_s26, %s149_s26 }
  0x21   : > { %p813_p9 = scmp.ne.s32.totalorder %s149_s26, %s812_s11  ;;  %p821_p8 = scmp.lt.s32.totalorder %s812_s11, %s812_s11 }
  0x23   : > { %p815_p6 = pnand %p813_p9, %p801_p0  ;;  %p822_p2 = por %p821_p8, %p820_p4 }
  0x25   : > { %p816_p1 = pneg %p815_p6 }
  0x27   : > { %p823_p12 = pnand %p822_p2, %p816_p1 }
  0x29   : > { %826 = shalt.err (!%p823_p12)
}
  0x2a   : > { %732 = dma.hbm_to_vmem [thread:$0]  (!%p1033_p11), %s1278_s1, 64, %s149_s26, [#allocation6]  }
  0x2b   : > { %p1292_p4 = scmp.ne.s32.totalorder %s1291_s30, 0  ;;  %p48_p1 = scmp.ne.s32.totalorder %s931_s14, %s927_s13 }
  0x2c   : > { %p49_p2 = scmp.eq.s32.totalorder %s943_s17, 0  ;;  %p742_p6 = scmp.lt.s32.totalorder %s943_s17, 2 }
  0x2d   : > { %s1307_s28 = smov (%p1292_p4, %s32_s28), 0  ;;  %p1293_p12 = scmp.ne.s32.totalorder %s1286_s21, 0 }
  0x2e   : > { %s36_s25 = ssub.s32 %s939_s16, %s1307_s28  ;;  %p50_p9 = por %p49_p2, %p48_p1 }
  0x2f   : > { %p39_p8 = scmp.eq.s32.totalorder %s36_s25, 0  ;;  %p1071_p13 = por %p1293_p12, %p48_p1 }
  0x30   : > { %s162_s4 = sand.u32 1, %s931_s14   ;;  %s664_s30 = sshll.u32 %s939_s16, 7 }
  0x31   : > { %s1079_s5 = scalar_select %p39_p8, %s931_s14, %s41_s29  }
  0x32   : > { %s633_s26 = sshll.u32 %s162_s4, 3  ;;  %s1085_s8 = scalar_lea.hbm %s1277_s0, %s664_s30 }
  0x33   : > { %s166_s21 = scalar_lea.vmem [#allocation2], %s633_s26  ;;  %p1089_p11 = pnand %p742_p6, %p50_p9 }
  0x34   : > { %s176_s9 = sshll.u32 %s166_s21, 4  ;;  %s163_s29 = scalar_lea.sflag [#allocation3], %s162_s4  ;;  %s1087_s9 = int_to_ptr.vmem [resolvable:$true] %s176_s9 }
  0x35   : > { %s827_s11 = scalar_lea.hbm %s1085_s8, 128  ;;  %p829_p3 = pneg %p1089_p11 }
  0x36   : > { %p828_p0 = scmp.ne.s32.totalorder %s1085_s8, %s827_s11  ;;  %s832_s25 = scalar_lea.hbm %s1277_s0, 256 }
  0x37   : > { %p833_p10 = scmp.lt.u32.totalorder %s1085_s8, %s1277_s0  ;;  %p834_p4 = scmp.lt.u32.totalorder %s832_s25, %s827_s11 }
  0x38   : > { %p830_p5 = pnand %p829_p3, %p828_p0  ;;  %p836_p2 = scmp.lt.u32.totalorder %s827_s11, %s1085_s8 }
  0x39   : > { %p835_p1 = por %p834_p4, %p833_p10 }
  0x3a   : > { %p831_p7 = pneg %p830_p5 }
  0x3b   : > { %p837_p6 = por %p836_p2, %p835_p1 }
  0x3d   : > { %p838_p8 = pnand %p837_p6, %p831_p7 }
  0x3f   : > { %841 = shalt.err (!%p838_p8)
}
  0x40   : > { %s842_s4 = scalar_lea.vmem %s1087_s9, 128  ;;  %s946_s6 = smov [#allocation2]  }
  0x41   : > { %p843_p9 = scmp.ne.s32.totalorder %s1087_s9, %s842_s4  ;;  %s847_s7 = sshll.u32 %s946_s6, 4  ;;  %s848_s7 = int_to_ptr.vmem [resolvable:$false] %s847_s7 }
  0x42   : > { %s849_s21 = scalar_lea.vmem %s848_s7, 256  ;;  %p850_p5 = scmp.lt.s32.totalorder %s1087_s9, %s848_s7 }
  0x43   : > { %p845_p12 = pnand %p843_p9, %p829_p3  ;;  %p851_p10 = scmp.lt.s32.totalorder %s849_s21, %s842_s4 }
  0x45   : > { %p846_p0 = pneg %p845_p12  ;;  %p852_p4 = por %p851_p10, %p850_p5 }
  0x47   : > { %p853_p1 = pnand %p852_p4, %p846_p0 }
  0x49   : > { %856 = shalt.err (!%p853_p1)
}
  0x4a   : > { %736 = dma.hbm_to_vmem [thread:$0]  (!%p1089_p11), %s1085_s8, 128, %s1087_s9, %s163_s29  }
  0x4b   : > { %p1296_p7 = scmp.ne.s32.totalorder %s1289_s24, 0 }
  0x4c   : > { %s1121_s11 = sand.u32 (!%p1296_p7), 1, %s927_s13   ;;  %p1297_p3 = scmp.ne.s32.totalorder (!%p1296_p7), %s1287_s22, 0 }
  0x4d   : > { %185 = sbr.rel (%p1296_p7) target bundleno = 486 (0x1e6), region = 32  ;;  %s637_s18 = sshll.u32 (!%p1296_p7), %s1121_s11, 3 }
  0x4e   : > { %s188_s19 = scalar_lea.sflag (!%p1296_p7), [#allocation3], %s1121_s11  ;;  %s191_s25 = scalar_lea.vmem (!%p1296_p7), [#allocation2], %s637_s18 }
  0x54   : > { %910 = dma.done.wait (%p1297_p3), %s188_s19, 128  }
  0x55   : > { %912 = vsyncadd (%p1297_p3), %s188_s19, 4294967168  ;;  %p1298_p2 = scmp.ne.s32.totalorder %s1285_s20, 0 }
  0x57   : > { %914 = dma.done.wait (%p1298_p2), [#allocation6], 64  }
  0x58   : > { %916 = vsyncadd (%p1298_p2), [#allocation6], 4294967232  ;;  %vm318_vm0 = vcmask 1043456   ;;  %v221_v0 = vld [vmem:[%s191_s25] sm:$0xff]  ;;  %v222_v1 = vld [vmem:[#allocation5] sm:$0xf] }
  0x59   : > { %v641_v2 = vcombine.low %v221_v0, %v221_v0  ;;  %719 = vmatprep.subr.msk.bf16.mxu0 %vm318_vm0, %v222_v1  ;;  %v320_v3 = vsel %vm318_vm0, %v222_v1, 0  ;;  %720 = vmatprep.subr.msk.bf16.mxu1 %vm318_vm0, %v222_v1  ;;  %v642_v4 = vcombine.high %v221_v0, %v221_v0  ;;  %vm269_vm1 = vcmask 64512   ;;  %s639_s20 = sshll.u32 %s1121_s11, 8  ;;  %v1153_v21 = vld [vmem:[%s1279_s2] ss:$0 sm:$0xff]  ;;  %s665_s9 = sshll.u32 %s935_s15, 12 }
  0x5a   : > { %684 = vmatpush3.bf16.msra.mxu0 %v320_v3  ;;  %718 = vmatpush3.bf16.msra.mxu1 %v320_v3  ;;  %s1157_s8 = scalar_lea.vmem [#allocation7], %s639_s20  ;;  %s1222_s30 = scalar_lea.hbm %s1280_s3, %s665_s9 }
  0x5b   : > { %237 = vxpose.xlu0.c.b16.start.end [1/1] (short) %v641_v2, 128  ;;  %s531_s10 = sshll.u32 %s1157_s8, 4  ;;  %s516_s15 = scalar_lea.sflag [#allocation4], %s1121_s11  ;;  %s1224_s10 = int_to_ptr.vmem [resolvable:$true] %s531_s10 }
  0x5c   : > { %s857_s4 = scalar_lea.vmem %s1224_s10, 4096  ;;  %s947_s6 = smov [#allocation7]  }
  0x5d   : > { %p858_p11 = scmp.ne.s32.totalorder %s1224_s10, %s857_s4  ;;  %s861_s7 = sshll.u32 %s947_s6, 4  ;;  %s862_s7 = int_to_ptr.vmem [resolvable:$false] %s861_s7 }
  0x5e   : > { %s863_s21 = scalar_lea.vmem %s862_s7, 8192  ;;  %p864_p9 = scmp.lt.s32.totalorder %s1224_s10, %s862_s7 }
  0x5f   : > { %p859_p6 = pnand %p858_p11, %p1071_p13  ;;  %p865_p12 = scmp.lt.s32.totalorder %s863_s21, %s857_s4 }
  0x61   : > { %p860_p8 = pneg %p859_p6  ;;  %p866_p0 = por %p865_p12, %p864_p9 }
  0x63   : > { %p867_p5 = pnand %p866_p0, %p860_p8 }
  0x78   : > { %253 = vxpose.xlu0.c.b16.start.end [1/1] (short) %v642_v4, 128 }
  0xc1   : > { %v245_v5 = vpop.trf.xlu0 }
  0xc2   : > { %685 = vmatprep.mubr.msk.bf16.mxu0 %vm269_vm1, %v245_v5 }
  0xc5   : > { %v246_v6 = vpop.trf.xlu0 }
  0xc6   : > { %686 = vmatmul.mubr.msk.bf16.vlgmr.msra.gmra.mrb[0].mxu0 %vm269_vm1, %v246_v6 }
  0xc9   : > { %v247_v7 = vpop.trf.xlu0 }
  0xca   : > { %689 = vmatprep.mubr.msk.bf16.mxu0 %vm269_vm1, %v247_v7 }
  0xcd   : > { %v248_v8 = vpop.trf.xlu0 }
  0xce   : > { %690 = vmatmul.mubr.msk.bf16.gmra.mrb[4].mxu0 %vm269_vm1, %v248_v8 }
  0xd1   : > { %v249_v9 = vpop.trf.xlu0 }
  0xd2   : > { %693 = vmatprep.mubr.msk.bf16.mxu0 %vm269_vm1, %v249_v9 }
  0xd5   : > { %v250_v10 = vpop.trf.xlu0 }
  0xd6   : > { %694 = vmatmul.mubr.msk.bf16.gmra.mrb[8].mxu0 %vm269_vm1, %v250_v10 }
  0xd9   : > { %v251_v11 = vpop.trf.xlu0 }
  0xda   : > { %697 = vmatprep.mubr.msk.bf16.mxu0 %vm269_vm1, %v251_v11 }
  0xdd   : > { %v252_v12 = vpop.trf.xlu0 }
  0xde   : > { %698 = vmatmul.mubr.msk.bf16.gmra.mrb[12].mxu0 %vm269_vm1, %v252_v12 }
  0xe1   : > { %v261_v13 = vpop.trf.xlu0 }
  0xe2   : > { %701 = vmatprep.mubr.msk.bf16.mxu1 %vm269_vm1, %v261_v13 }
  0xe5   : > { %v262_v14 = vpop.trf.xlu0 }
  0xe6   : > { %702 = vmatmul.mubr.msk.bf16.vlgmr.msra.gmra.mrb[0].mxu1 %vm269_vm1, %v262_v14 }
  0xe9   : > { %v263_v15 = vpop.trf.xlu0 }
  0xea   : > { %705 = vmatprep.mubr.msk.bf16.mxu1 %vm269_vm1, %v263_v15 }
  0xed   : > { %v264_v16 = vpop.trf.xlu0 }
  0xee   : > { %706 = vmatmul.mubr.msk.bf16.gmra.mrb[4].mxu1 %vm269_vm1, %v264_v16 }
  0xf1   : > { %v265_v17 = vpop.trf.xlu0 }
  0xf2   : > { %709 = vmatprep.mubr.msk.bf16.mxu1 %vm269_vm1, %v265_v17 }
  0xf5   : > { %v266_v18 = vpop.trf.xlu0 }
  0xf6   : > { %710 = vmatmul.mubr.msk.bf16.gmra.mrb[8].mxu1 %vm269_vm1, %v266_v18 }
  0xf9   : > { %v267_v19 = vpop.trf.xlu0 }
  0xfa   : > { %713 = vmatprep.mubr.msk.bf16.mxu1 %vm269_vm1, %v267_v19 }
  0xfd   : > { %v268_v20 = vpop.trf.xlu0 }
  0xfe   : > { %714 = vmatmul.mubr.msk.bf16.gmra.mrb[12].mxu1 %vm269_vm1, %v268_v20 }
 0x199   : > { %v687_v22 = vpop.f32.mrb[0].mxu0 }
 0x19a   : > { %v365_v23 = vadd.f32 %v687_v22, %v1153_v21  ;;  %v356_v24 = vpop.f32.mrb[1].mxu0 }
 0x19b   : > { %v357_v25 = vadd.f32 %v1153_v21, %v356_v24  ;;  %v688_v26 = vpop.f32.mrb[2].mxu0 }
 0x19c   : > { %485 = vst [vmem:[%s1157_s8 + $0x10] sm:$0xff] %v365_v23  ;;  %v368_v27 = vadd.f32 %v688_v26, %v1153_v21  ;;  %v359_v28 = vpop.f32.mrb[3].mxu0 }
 0x19d   : > { %483 = vst [vmem:[%s1157_s8] sm:$0xff] %v357_v25  ;;  %v360_v29 = vadd.f32 %v1153_v21, %v359_v28 }
 0x19e   : > { %486 = vst [vmem:[%s1157_s8 + $0x18] sm:$0xff] %v368_v27 }
 0x19f   : > { %484 = vst [vmem:[%s1157_s8 + $0x8] sm:$0xff] %v360_v29 }
 0x1a1   : > { %v691_v30 = vpop.f32.mrb[4].mxu0 }
 0x1a2   : > { %v381_v31 = vadd.f32 %v691_v30, %v1153_v21  ;;  %v372_v32 = vpop.f32.mrb[5].mxu0 }
 0x1a3   : > { %v373_v33 = vadd.f32 %v1153_v21, %v372_v32  ;;  %v692_v34 = vpop.f32.mrb[6].mxu0 }
 0x1a4   : > { %489 = vst [vmem:[%s1157_s8 + $0x30] sm:$0xff] %v381_v31  ;;  %v384_v35 = vadd.f32 %v692_v34, %v1153_v21  ;;  %v375_v36 = vpop.f32.mrb[7].mxu0 }
 0x1a5   : > { %487 = vst [vmem:[%s1157_s8 + $0x20] sm:$0xff] %v373_v33  ;;  %v376_v37 = vadd.f32 %v1153_v21, %v375_v36 }
 0x1a6   : > { %490 = vst [vmem:[%s1157_s8 + $0x38] sm:$0xff] %v384_v35 }
 0x1a7   : > { %488 = vst [vmem:[%s1157_s8 + $0x28] sm:$0xff] %v376_v37 }
 0x1a9   : > { %v695_v38 = vpop.f32.mrb[8].mxu0 }
 0x1aa   : > { %v397_v39 = vadd.f32 %v695_v38, %v1153_v21  ;;  %v388_v40 = vpop.f32.mrb[9].mxu0 }
 0x1ab   : > { %v389_v41 = vadd.f32 %v1153_v21, %v388_v40  ;;  %v696_v42 = vpop.f32.mrb[10].mxu0 }
 0x1ac   : > { %493 = vst [vmem:[%s1157_s8 + $0x50] sm:$0xff] %v397_v39  ;;  %v400_v43 = vadd.f32 %v696_v42, %v1153_v21  ;;  %v391_v44 = vpop.f32.mrb[11].mxu0 }
 0x1ad   : > { %491 = vst [vmem:[%s1157_s8 + $0x40] sm:$0xff] %v389_v41  ;;  %v392_v45 = vadd.f32 %v1153_v21, %v391_v44 }
 0x1ae   : > { %494 = vst [vmem:[%s1157_s8 + $0x58] sm:$0xff] %v400_v43 }
 0x1af   : > { %492 = vst [vmem:[%s1157_s8 + $0x48] sm:$0xff] %v392_v45 }
 0x1b1   : > { %v699_v46 = vpop.f32.mrb[12].mxu0 }
 0x1b2   : > { %v413_v47 = vadd.f32 %v699_v46, %v1153_v21  ;;  %v404_v48 = vpop.f32.mrb[13].mxu0 }
 0x1b3   : > { %v405_v49 = vadd.f32 %v1153_v21, %v404_v48  ;;  %v700_v50 = vpop.f32.mrb[14].mxu0 }
 0x1b4   : > { %497 = vst [vmem:[%s1157_s8 + $0x70] sm:$0xff] %v413_v47  ;;  %v416_v51 = vadd.f32 %v700_v50, %v1153_v21  ;;  %v407_v52 = vpop.f32.mrb[15].mxu0 }
 0x1b5   : > { %495 = vst [vmem:[%s1157_s8 + $0x60] sm:$0xff] %v405_v49  ;;  %v408_v53 = vadd.f32 %v1153_v21, %v407_v52 }
 0x1b6   : > { %498 = vst [vmem:[%s1157_s8 + $0x78] sm:$0xff] %v416_v51 }
 0x1b7   : > { %496 = vst [vmem:[%s1157_s8 + $0x68] sm:$0xff] %v408_v53 }
 0x1b9   : > { %v703_v54 = vpop.f32.mrb[0].mxu1 }
 0x1ba   : > { %v429_v55 = vadd.f32 %v703_v54, %v1153_v21  ;;  %v420_v56 = vpop.f32.mrb[1].mxu1 }
 0x1bb   : > { %v421_v57 = vadd.f32 %v1153_v21, %v420_v56  ;;  %v704_v58 = vpop.f32.mrb[2].mxu1 }
 0x1bc   : > { %501 = vst [vmem:[%s1157_s8 + $0x90] sm:$0xff] %v429_v55  ;;  %v432_v59 = vadd.f32 %v704_v58, %v1153_v21  ;;  %v423_v60 = vpop.f32.mrb[3].mxu1 }
 0x1bd   : > { %499 = vst [vmem:[%s1157_s8 + $0x80] sm:$0xff] %v421_v57  ;;  %v424_v61 = vadd.f32 %v1153_v21, %v423_v60 }
 0x1be   : > { %502 = vst [vmem:[%s1157_s8 + $0x98] sm:$0xff] %v432_v59 }
 0x1bf   : > { %500 = vst [vmem:[%s1157_s8 + $0x88] sm:$0xff] %v424_v61 }
 0x1c1   : > { %v707_v62 = vpop.f32.mrb[4].mxu1 }
 0x1c2   : > { %v445_v63 = vadd.f32 %v707_v62, %v1153_v21  ;;  %v436_v0 = vpop.f32.mrb[5].mxu1 }
 0x1c3   : > { %v437_v1 = vadd.f32 %v1153_v21, %v436_v0  ;;  %v708_v2 = vpop.f32.mrb[6].mxu1 }
 0x1c4   : > { %505 = vst [vmem:[%s1157_s8 + $0xb0] sm:$0xff] %v445_v63  ;;  %v448_v3 = vadd.f32 %v708_v2, %v1153_v21  ;;  %v439_v4 = vpop.f32.mrb[7].mxu1 }
 0x1c5   : > { %503 = vst [vmem:[%s1157_s8 + $0xa0] sm:$0xff] %v437_v1  ;;  %v440_v5 = vadd.f32 %v1153_v21, %v439_v4 }
 0x1c6   : > { %506 = vst [vmem:[%s1157_s8 + $0xb8] sm:$0xff] %v448_v3 }
 0x1c7   : > { %504 = vst [vmem:[%s1157_s8 + $0xa8] sm:$0xff] %v440_v5 }
 0x1c9   : > { %v711_v6 = vpop.f32.mrb[8].mxu1 }
 0x1ca   : > { %v461_v7 = vadd.f32 %v711_v6, %v1153_v21  ;;  %v452_v8 = vpop.f32.mrb[9].mxu1 }
 0x1cb   : > { %v453_v9 = vadd.f32 %v1153_v21, %v452_v8  ;;  %v712_v10 = vpop.f32.mrb[10].mxu1 }
 0x1cc   : > { %509 = vst [vmem:[%s1157_s8 + $0xd0] sm:$0xff] %v461_v7  ;;  %v464_v11 = vadd.f32 %v712_v10, %v1153_v21  ;;  %v455_v12 = vpop.f32.mrb[11].mxu1 }
 0x1cd   : > { %507 = vst [vmem:[%s1157_s8 + $0xc0] sm:$0xff] %v453_v9  ;;  %v456_v13 = vadd.f32 %v1153_v21, %v455_v12 }
 0x1ce   : > { %510 = vst [vmem:[%s1157_s8 + $0xd8] sm:$0xff] %v464_v11 }
 0x1cf   : > { %508 = vst [vmem:[%s1157_s8 + $0xc8] sm:$0xff] %v456_v13 }
 0x1d1   : > { %v715_v14 = vpop.f32.mrb[12].mxu1 }
 0x1d2   : > { %v477_v15 = vadd.f32 %v715_v14, %v1153_v21  ;;  %v468_v16 = vpop.f32.mrb[13].mxu1 }
 0x1d3   : > { %v469_v17 = vadd.f32 %v1153_v21, %v468_v16  ;;  %v716_v18 = vpop.f32.mrb[14].mxu1 }
 0x1d4   : > { %513 = vst [vmem:[%s1157_s8 + $0xf0] sm:$0xff] %v477_v15  ;;  %v480_v19 = vadd.f32 %v716_v18, %v1153_v21  ;;  %v471_v20 = vpop.f32.mrb[15].mxu1 }
 0x1d5   : > { %511 = vst [vmem:[%s1157_s8 + $0xe0] sm:$0xff] %v469_v17  ;;  %v472_v22 = vadd.f32 %v1153_v21, %v471_v20 }
 0x1d6   : > { %514 = vst [vmem:[%s1157_s8 + $0xf8] sm:$0xff] %v480_v19 }
 0x1d7   : > { %512 = vst [vmem:[%s1157_s8 + $0xe8] sm:$0xff] %v472_v22 }
 0x1d8   : > { %870 = shalt.err (!%p867_p5)
}
 0x1d9   : > { %s871_s18 = scalar_lea.hbm %s1222_s30, 4096  ;;  %s875_s20 = scalar_lea.hbm %s1280_s3, 8192 }
 0x1da   : > { %p872_p10 = scmp.ne.s32.totalorder %s1222_s30, %s871_s18  ;;  %p876_p7 = scmp.lt.u32.totalorder %s1222_s30, %s1280_s3 }
 0x1db   : > { %p877_p3 = scmp.lt.u32.totalorder %s875_s20, %s871_s18  ;;  %p879_p11 = scmp.lt.u32.totalorder %s871_s18, %s1222_s30 }
 0x1dc   : > { %p873_p4 = pnand %p872_p10, %p1071_p13 }
 0x1dd   : > { %p878_p2 = por %p877_p3, %p876_p7 }
 0x1de   : > { %p874_p1 = pneg %p873_p4 }
 0x1df   : > { %p880_p6 = por %p879_p11, %p878_p2 }
 0x1e1   : > { %p881_p8 = pnand %p880_p6, %p874_p1 }
 0x1e3   : > { %884 = shalt.err (!%p881_p8)
}
 0x1e4   : > { %s948_s8 = smov 128   ;;  %s949_s9 = smov 8  }
 0x1e5   : > { %727 = dma.vmem_to_hbm [thread:$0]  (%p1071_p13), %s1224_s10, 4096, %s1222_s30, %s516_s15, %s948_s8, %s948_s8, %s949_s9  }
 0x1e6 PF: > { %s546_s29 = sand.u32 1, %s923_s12   ;;  %p1299_p9 = scmp.ne.s32.totalorder %s1288_s23, 0 }
 0x1e7   : > { %p1300_p12 = scmp.ge.s32.totalorder %s943_s17, 2  ;;  %s547_s26 = scalar_lea.sflag [#allocation4], %s546_s29 }
 0x1e9   : > { %p738_p0 = pnand %p1300_p12, %p1299_p9 }
 0x1eb   : > { %918 = dma.done.wait (!%p738_p0), %s547_s26, 4096  }
 0x1ec   : > { %920 = vsyncadd (!%p738_p0), %s547_s26, 4294963200  ;;  %s20_s17 = sadd.s32 1, %s943_s17   ;;  %s1301_s12 = smov %s927_s13 }
 0x1ed   : > { %p17_p5 = scmp.ge.s32.totalorder %s20_s17, 4   ;;  %s1302_s13 = smov %s931_s14 }
 0x1ee   : > { %s1303_s14 = smov %s1079_s5  ;;  %s1304_s15 = smov %s939_s16 }
 0x1ef   : > { %s1305_s16 = smov %s1307_s28  ;;  %19 = sbr.rel (!%p17_p5) target bundleno = 7 (0x7), region = 81 }
 0x1f6   :  { %552 = vsyncpa [#allocation3], 1 }
 0x1f7   :  { %554 = vsyncpa [#allocation3 + $0x1], 1 }
 0x1f8   :  { %555 = vsyncpa [#allocation6], 1 }
 0x1f9   :  { %556 = vsyncpa [#allocation4], 1 }
 0x1fa   :  { %558 = vsyncpa [#allocation4 + $0x1], 1 }

</bundles_post_ra>
